<compile_context>
chip_gen: v7x
topology: tpu7x:2x2x1
jax: 0.10.0
libtpu: 0.0.40
codegen_flags: <defaults>
</compile_context>

<pallas_src>
import jax
import jax.numpy as jnp
from jax.experimental import pallas as pl
from jax.experimental.pallas import tpu as pltpu

LANE = 128                 # every feature (lane) dim is zero-padded to this
VMEM_LIMIT = 48 << 20      # safe on v5e/v6e (128 MiB phys) and v7x (64 MiB)


# ---------------------------------------------------------------------------
# Kernel 1: layer-1 aggregation, fused with bias/ReLU and the H @ W2 transform
#   hw2[i] = relu(A_hat[i, :] @ (X @ W1) + b1) @ W2
#   grid = (row tiles, K tiles); K is the contraction over A_hat columns.
# ---------------------------------------------------------------------------
def _gcn_layer1_kernel(a_ref, xw1_ref, b1_ref, w2_ref, hw2_ref, acc_ref):
    k = pl.program_id(1)

    @pl.when(k == 0)
    def _():
        acc_ref[...] = jnp.zeros_like(acc_ref)

    acc_ref[...] += jnp.dot(a_ref[...], xw1_ref[...],
                            preferred_element_type=jnp.float32)

    @pl.when(k == pl.num_programs(1) - 1)
    def _():
        h = jnp.maximum(acc_ref[...] + b1_ref[...], 0.0)
        hw2_ref[...] = jnp.dot(h.astype(jnp.bfloat16), w2_ref[...],
                               preferred_element_type=jnp.float32
                               ).astype(hw2_ref.dtype)


def gcn_layer1(a_hat, xw1, b1, w2, *, n_pad, tile_m, tile_k):
    return pl.pallas_call(
        _gcn_layer1_kernel,
        out_shape=jax.ShapeDtypeStruct((n_pad, LANE), jnp.bfloat16),
        grid_spec=pltpu.PrefetchScalarGridSpec(
            num_scalar_prefetch=0,
            grid=(n_pad // tile_m, n_pad // tile_k),
            in_specs=[
                pl.BlockSpec((tile_m, tile_k), lambda i, k: (i, k)),  # A rows
                pl.BlockSpec((tile_k, LANE), lambda i, k: (k, 0)),    # X @ W1
                pl.BlockSpec((1, LANE), lambda i, k: (0, 0)),         # b1
                pl.BlockSpec((LANE, LANE), lambda i, k: (0, 0)),      # W2
            ],
            out_specs=pl.BlockSpec((tile_m, LANE), lambda i, k: (i, 0)),
            scratch_shapes=[pltpu.VMEM((tile_m, LANE), jnp.float32)],
        ),
        compiler_params=pltpu.CompilerParams(
            dimension_semantics=("parallel", "arbitrary"),
            vmem_limit_bytes=VMEM_LIMIT),
    )(a_hat, xw1, b1, w2)


# ---------------------------------------------------------------------------
# Kernel 2: layer-2 aggregation, fused with bias and the per-node halves of
# the edge-classifier first Linear:
#   h2[i] = A_hat[i, :] @ hw2 + b2
#   p[i]  = h2[i] @ EW1a          (consumed as p[row] downstream)
#   q[i]  = h2[i] @ EW1b          (consumed as q[col] downstream)
# ---------------------------------------------------------------------------
def _gcn_layer2_kernel(a_ref, hw2_ref, b2_ref, ew1a_ref, ew1b_ref,
                       p_ref, q_ref, acc_ref):
    k = pl.program_id(1)

    @pl.when(k == 0)
    def _():
        acc_ref[...] = jnp.zeros_like(acc_ref)

    acc_ref[...] += jnp.dot(a_ref[...], hw2_ref[...],
                            preferred_element_type=jnp.float32)

    @pl.when(k == pl.num_programs(1) - 1)
    def _():
        h2 = (acc_ref[...] + b2_ref[...]).astype(jnp.bfloat16)
        p_ref[...] = jnp.dot(h2, ew1a_ref[...],
                             preferred_element_type=jnp.float32
                             ).astype(p_ref.dtype)
        q_ref[...] = jnp.dot(h2, ew1b_ref[...],
                             preferred_element_type=jnp.float32
                             ).astype(q_ref.dtype)


def gcn_layer2(a_hat, hw2, b2, ew1a, ew1b, *, n_pad, tile_m, tile_k):
    return pl.pallas_call(
        _gcn_layer2_kernel,
        out_shape=(jax.ShapeDtypeStruct((n_pad, LANE), jnp.bfloat16),
                   jax.ShapeDtypeStruct((n_pad, LANE), jnp.bfloat16)),
        grid_spec=pltpu.PrefetchScalarGridSpec(
            num_scalar_prefetch=0,
            grid=(n_pad // tile_m, n_pad // tile_k),
            in_specs=[
                pl.BlockSpec((tile_m, tile_k), lambda i, k: (i, k)),  # A rows
                pl.BlockSpec((tile_k, LANE), lambda i, k: (k, 0)),    # hw2
                pl.BlockSpec((1, LANE), lambda i, k: (0, 0)),         # b2
                pl.BlockSpec((LANE, LANE), lambda i, k: (0, 0)),      # EW1a
                pl.BlockSpec((LANE, LANE), lambda i, k: (0, 0)),      # EW1b
            ],
            out_specs=[pl.BlockSpec((tile_m, LANE), lambda i, k: (i, 0)),
                       pl.BlockSpec((tile_m, LANE), lambda i, k: (i, 0))],
            scratch_shapes=[pltpu.VMEM((tile_m, LANE), jnp.float32)],
        ),
        compiler_params=pltpu.CompilerParams(
            dimension_semantics=("parallel", "arbitrary"),
            vmem_limit_bytes=VMEM_LIMIT),
    )(a_hat, hw2, b2, ew1a, ew1b)


# ---------------------------------------------------------------------------
# Kernel 3: per-edge tail of the classifier MLP.
#   hid    = relu(p[row] + q[col] + eb1)      (Linear(64,16) already per-node)
#   logit  = hid @ EW2 + eb2
#   score  = softmax over size-1 dim == 1.0   (constant; data-dep preserved)
# ---------------------------------------------------------------------------
def _edge_mlp_kernel(p_ref, q_ref, eb1_ref, ew2_ref, eb2_ref, o_ref):
    hid = p_ref[...].astype(jnp.float32) + q_ref[...].astype(jnp.float32)
    hid = jnp.maximum(hid + eb1_ref[...], 0.0)
    logit = jnp.dot(hid.astype(jnp.bfloat16), ew2_ref[...],
                    preferred_element_type=jnp.float32) + eb2_ref[...]
    # nn.Softmax over a size-1 last dim is identically 1.0 for finite logits;
    # skip exp/reduce while keeping the data dependence on the logit.
    o_ref[...] = (logit * 0.0 + 1.0).astype(o_ref.dtype)


def edge_mlp(p_row, q_col, eb1, ew2, eb2, *, e_pad, tile):
    return pl.pallas_call(
        _edge_mlp_kernel,
        out_shape=jax.ShapeDtypeStruct((e_pad, LANE), jnp.bfloat16),
        grid_spec=pltpu.PrefetchScalarGridSpec(
            num_scalar_prefetch=0,
            grid=(e_pad // tile,),
            in_specs=[
                pl.BlockSpec((tile, LANE), lambda e: (e, 0)),   # p[row]
                pl.BlockSpec((tile, LANE), lambda e: (e, 0)),   # q[col]
                pl.BlockSpec((1, LANE), lambda e: (0, 0)),      # eb1
                pl.BlockSpec((LANE, LANE), lambda e: (0, 0)),   # EW2
                pl.BlockSpec((1, LANE), lambda e: (0, 0)),      # eb2
            ],
            out_specs=pl.BlockSpec((tile, LANE), lambda e: (e, 0)),
        ),
        compiler_params=pltpu.CompilerParams(
            dimension_semantics=("parallel",),
            vmem_limit_bytes=VMEM_LIMIT),
    )(p_row, q_col, eb1, ew2, eb2)


# ---------------------------------------------------------------------------
# Glue: normalized adjacency, padding, parameters, full forward
# ---------------------------------------------------------------------------
def build_normalized_adjacency(edge_index, num_nodes):
    """Dense A_hat = D^-1/2 (A + I) D^-1/2, matching PyG GCNConv defaults."""
    # TODO(synk): for realistically sparse TSP graphs, replace this dense
    # O(N^2) A_hat with a CSR/blocked-sparse SpMM (row-ptr/col-idx via scalar
    # prefetch + manual make_async_copy gathers) -- the biggest lever at scale.
    src = edge_index[0]
    dst = edge_index[1]
    loops = jnp.arange(num_nodes, dtype=src.dtype)
    src = jnp.concatenate([src, loops])
    dst = jnp.concatenate([dst, loops])
    w = jnp.ones(src.shape[0], dtype=jnp.float32)
    deg = jnp.zeros((num_nodes,), jnp.float32).at[dst].add(w)
    dinv = jnp.where(deg > 0, 1.0 / jnp.sqrt(deg), 0.0)
    norm = dinv[src] * dinv[dst]
    a_hat = jnp.zeros((num_nodes, num_nodes), jnp.float32).at[dst, src].add(norm)
    return a_hat


def _pad2(x, rows, cols):
    """Zero-pad a 2-D array up to (rows, cols)."""
    out = jnp.zeros((rows, cols), x.dtype)
    return out.at[: x.shape[0], : x.shape[1]].set(x)


def init_params(num_features=9, key=jax.random.PRNGKey(42)):
    k1, k2, k3, k4 = jax.random.split(key, 4)

    def glorot(k, shape):
        fan_in, fan_out = shape
        lim = jnp.sqrt(6.0 / (fan_in + fan_out))
        return jax.random.uniform(k, shape, jnp.float32, -lim, lim)

    return {
        "w1": glorot(k1, (num_features, 64)),
        "b1": jnp.zeros((1, 64), jnp.float32),
        "w2": glorot(k2, (64, 32)),
        "b2": jnp.zeros((1, 32), jnp.float32),
        "ew1": glorot(k3, (64, 16)),
        "eb1": jnp.zeros((1, 16), jnp.float32),
        "ew2": glorot(k4, (16, 1)),
        "eb2": jnp.zeros((1, 1), jnp.float32),
    }


def tsp_pruning_gnn_forward(params, x, edge_index, *,
                            node_tile=256, k_tile_max=1024, edge_tile=512):
    n, _ = x.shape

    # Padded node count must be divisible by both the row tile and the K tile.
    n_pad = max(pl.cdiv(n, node_tile) * node_tile, node_tile)
    tile_k = min(k_tile_max, n_pad)
    n_pad = pl.cdiv(n_pad, tile_k) * tile_k

    # --- normalized adjacency + padding (plain JAX glue) --------------------
    a_hat = build_normalized_adjacency(edge_index, n)
    # TODO(synk): quantize A_hat to int8 (+scale) on v5e/v6e and fp8 e4m3 on
    # v7x to halve the dominant HBM traffic of the two A_hat streams.
    a_pad = _pad2(a_hat, n_pad, n_pad).astype(jnp.bfloat16)

    # --- layer-1 feature transform hoisted out of the kernel (tiny) ---------
    x_pad = _pad2(x, n_pad, LANE).astype(jnp.bfloat16)
    w1 = _pad2(params["w1"], LANE, LANE).astype(jnp.bfloat16)
    xw1 = jnp.dot(x_pad, w1,
                  preferred_element_type=jnp.float32).astype(jnp.bfloat16)

    b1 = _pad2(params["b1"], 1, LANE)                          # f32
    w2 = _pad2(params["w2"], LANE, LANE).astype(jnp.bfloat16)
    b2 = _pad2(params["b2"], 1, LANE)                          # f32

    # Edge-classifier Linear(64,16) split into per-node halves:
    #   concat([h[row], h[col]]) @ EW1 == h[row] @ EW1a + h[col] @ EW1b
    ew1a = _pad2(params["ew1"][:32], LANE, LANE).astype(jnp.bfloat16)
    ew1b = _pad2(params["ew1"][32:], LANE, LANE).astype(jnp.bfloat16)

    # --- two GCN layers as two row-parallel, K-tiled pallas_calls -----------
    hw2 = gcn_layer1(a_pad, xw1, b1, w2, n_pad=n_pad,
                     tile_m=node_tile, tile_k=tile_k)          # [n_pad,128] bf16
    p, q = gcn_layer2(a_pad, hw2, b2, ew1a, ew1b, n_pad=n_pad,
                      tile_m=node_tile, tile_k=tile_k)         # [n_pad,128] bf16

    # --- per-edge gather of the 16-wide per-node halves (plain JAX glue) ----
    # TODO(synk): move this gather into the Pallas pipeline (scalar-prefetch
    # row/col indices + in-kernel DMA gather) so p/q never round-trip via XLA.
    row, col = edge_index[0], edge_index[1]
    e = row.shape[0]
    e_pad = max(pl.cdiv(e, edge_tile) * edge_tile, edge_tile)
    row_p = jnp.zeros((e_pad,), row.dtype).at[:e].set(row)
    col_p = jnp.zeros((e_pad,), col.dtype).at[:e].set(col)
    p_row = jnp.take(p, row_p, axis=0)
    q_col = jnp.take(q, col_p, axis=0)

    eb1 = _pad2(params["eb1"], 1, LANE)                        # f32
    ew2 = _pad2(params["ew2"], LANE, LANE).astype(jnp.bfloat16)
    eb2 = _pad2(params["eb2"], 1, LANE)                        # f32

    scores = edge_mlp(p_row, q_col, eb1, ew2, eb2,
                      e_pad=e_pad, tile=edge_tile)             # [e_pad,128] bf16
    return scores[:e, :1].astype(jnp.float32)                  # [E, 1]


# ---------------------------------------------------------------------------
if __name__ == "__main__":
    key = jax.random.PRNGKey(0)
    k_x, k_params = jax.random.split(key)

    num_nodes = 8
    num_features = 9

    # deterministic node features
    x = jax.random.normal(k_x, (num_nodes, num_features), jnp.float32)

    # deterministic edge set: bidirectional ring -> E = 16 directed edges
    src = jnp.arange(num_nodes, dtype=jnp.int32)
    dst = (src + 1) % num_nodes
    edge_index = jnp.stack(
        [jnp.concatenate([src, dst]), jnp.concatenate([dst, src])], axis=0
    )  # [2, 16]

    params = init_params(num_features, key=k_params)

    scores = tsp_pruning_gnn_forward(params, x, edge_index)
    scores = jax.block_until_ready(scores)

    assert scores.shape == (edge_index.shape[1], 1)
    assert bool(jnp.all(jnp.isfinite(scores)))
    # softmax over a size-1 last dim must yield exactly 1.0 everywhere
    assert bool(jnp.allclose(scores, 1.0, atol=1e-5))
    print("KERNEL_OK")
</pallas_src>

<mosaic_0001>
module attributes {stable_mosaic.version = 11 : i64} {
  func.func @_gcn_layer1_kernel(%arg0: i32, %arg1: i32, %arg2: memref<256x256xbf16, #tpu.memory_space<vmem>>, %arg3: memref<256x128xbf16, #tpu.memory_space<vmem>>, %arg4: memref<1x128xf32, #tpu.memory_space<vmem>>, %arg5: memref<128x128xbf16, #tpu.memory_space<vmem>>, %arg6: memref<256x128xbf16, #tpu.memory_space<vmem>>, %arg7: memref<256x128xf32, #tpu.memory_space<vmem>>) attributes {dimension_semantics = [#tpu.dimension_semantics<parallel>, #tpu.dimension_semantics<arbitrary>], iteration_bounds = array<i64: 1, 1>, scalar_prefetch = 0 : i64, scratch_operands = 1 : i64, tpu.core_type = #tpu.core_type<tc>, window_params = [{transform_indices = @transform_0, window_bounds = array<i64: 256, 256>}, {transform_indices = @transform_1, window_bounds = array<i64: 256, 128>}, {pipeline_mode = #tpu.pipeline_mode<synchronous>, transform_indices = @transform_2, window_bounds = array<i64: 1, 128>}, {pipeline_mode = #tpu.pipeline_mode<synchronous>, transform_indices = @transform_3, window_bounds = array<i64: 128, 128>}, {transform_indices = @transform_4, window_bounds = array<i64: 256, 128>}]} {
    %c0_i32 = arith.constant 0 : i32
    %0 = arith.cmpi eq, %arg1, %c0_i32 : i32
    %1 = arith.extui %0 : i1 to i32
    %c0_i32_0 = arith.constant 0 : i32
    %2 = arith.cmpi ne, %1, %c0_i32_0 : i32
    scf.if %2 {
      %cst_10 = arith.constant 0.000000e+00 : f32
      %12 = vector.broadcast %cst_10 : f32 to vector<256x128xf32>
      %c0_11 = arith.constant 0 : index
      %c0_12 = arith.constant 0 : index
      %13 = vector.load %arg7[%c0_11, %c0_12] : memref<256x128xf32, #tpu.memory_space<vmem>>, vector<256x128xf32>
      tpu.vector_store %arg7[%c0_11, %c0_12], %12 {strides = array<i32>} : memref<256x128xf32, #tpu.memory_space<vmem>>, vector<256x128xf32>,
    } else {
    }
    %c0 = arith.constant 0 : index
    %c0_1 = arith.constant 0 : index
    %3 = vector.load %arg7[%c0, %c0_1] : memref<256x128xf32, #tpu.memory_space<vmem>>, vector<256x128xf32>
    %c0_2 = arith.constant 0 : index
    %c0_3 = arith.constant 0 : index
    %4 = vector.load %arg2[%c0_2, %c0_3] : memref<256x256xbf16, #tpu.memory_space<vmem>>, vector<256x256xbf16>
    %c0_4 = arith.constant 0 : index
    %c0_5 = arith.constant 0 : index
    %5 = vector.load %arg3[%c0_4, %c0_5] : memref<256x128xbf16, #tpu.memory_space<vmem>>, vector<256x128xbf16>
    %cst = arith.constant dense<0.000000e+00> : vector<256x128xf32>
    %6 = tpu.matmul %4, %5, %cst {dimension_numbers = #tpu.dot_dimension_numbers<[1], [0], [0], [1], [0, 0, 1, 1], [], []>} : vector<256x256xbf16>, vector<256x128xbf16>, vector<256x128xf32> -> vector<256x128xf32>
    %7 = arith.addf %3, %6 : vector<256x128xf32>
    %c0_6 = arith.constant 0 : index
    %c0_7 = arith.constant 0 : index
    %8 = vector.load %arg7[%c0_6, %c0_7] : memref<256x128xf32, #tpu.memory_space<vmem>>, vector<256x128xf32>
    tpu.vector_store %arg7[%c0_6, %c0_7], %7 {strides = array<i32>} : memref<256x128xf32, #tpu.memory_space<vmem>>, vector<256x128xf32>,
    %c0_i32_8 = arith.constant 0 : i32
    %9 = arith.cmpi eq, %arg1, %c0_i32_8 : i32
    %10 = arith.extui %9 : i1 to i32
    %c0_i32_9 = arith.constant 0 : i32
    %11 = arith.cmpi ne, %10, %c0_i32_9 : i32
    scf.if %11 {
      %c0_10 = arith.constant 0 : index
      %c0_11 = arith.constant 0 : index
      %12 = vector.load %arg7[%c0_10, %c0_11] : memref<256x128xf32, #tpu.memory_space<vmem>>, vector<256x128xf32>
      %c0_12 = arith.constant 0 : index
      %c0_13 = arith.constant 0 : index
      %13 = vector.load %arg4[%c0_12, %c0_13] : memref<1x128xf32, #tpu.memory_space<vmem>>, vector<1x128xf32>
      %14 = vector.broadcast %13 : vector<1x128xf32> to vector<256x128xf32>
      %15 = arith.addf %12, %14 : vector<256x128xf32>
      %cst_14 = arith.constant 0.000000e+00 : f32
      %16 = vector.broadcast %cst_14 : f32 to vector<256x128xf32>
      %17 = arith.maximumf %15, %16 : vector<256x128xf32>
      %18 = arith.truncf %17 : vector<256x128xf32> to vector<256x128xbf16>
      %c0_15 = arith.constant 0 : index
      %c0_16 = arith.constant 0 : index
      %19 = vector.load %arg5[%c0_15, %c0_16] : memref<128x128xbf16, #tpu.memory_space<vmem>>, vector<128x128xbf16>
      %cst_17 = arith.constant dense<0.000000e+00> : vector<256x128xf32>
      %20 = tpu.matmul %18, %19, %cst_17 {dimension_numbers = #tpu.dot_dimension_numbers<[1], [0], [0], [1], [0, 0, 1, 1], [], []>} : vector<256x128xbf16>, vector<128x128xbf16>, vector<256x128xf32> -> vector<256x128xf32>
      %21 = arith.truncf %20 : vector<256x128xf32> to vector<256x128xbf16>
      %c0_18 = arith.constant 0 : index
      %c0_19 = arith.constant 0 : index
      %22 = vector.load %arg6[%c0_18, %c0_19] : memref<256x128xbf16, #tpu.memory_space<vmem>>, vector<256x128xbf16>
      tpu.vector_store %arg6[%c0_18, %c0_19], %21 {strides = array<i32>} : memref<256x128xbf16, #tpu.memory_space<vmem>>, vector<256x128xbf16>,
    } else {
    }
    return
  }
  func.func @transform_0(%arg0: i32, %arg1: i32) -> (i32, i32) {
    %c0_i32 = arith.constant 0 : i32
    return %arg0, %arg1 : i32, i32
  }
  func.func @transform_1(%arg0: i32, %arg1: i32) -> (i32, i32) {
    %c0_i32 = arith.constant 0 : i32
    %c0_i32_0 = arith.constant 0 : i32
    return %arg1, %c0_i32 : i32, i32
  }
  func.func @transform_2(%arg0: i32, %arg1: i32) -> (i32, i32) {
    %c0_i32 = arith.constant 0 : i32
    %c0_i32_0 = arith.constant 0 : i32
    %c0_i32_1 = arith.constant 0 : i32
    return %c0_i32, %c0_i32_0 : i32, i32
  }
  func.func @transform_3(%arg0: i32, %arg1: i32) -> (i32, i32) {
    %c0_i32 = arith.constant 0 : i32
    %c0_i32_0 = arith.constant 0 : i32
    %c0_i32_1 = arith.constant 0 : i32
    return %c0_i32, %c0_i32_0 : i32, i32
  }
  func.func @transform_4(%arg0: i32, %arg1: i32) -> (i32, i32) {
    %c0_i32 = arith.constant 0 : i32
    %c0_i32_0 = arith.constant 0 : i32
    return %arg0, %c0_i32 : i32, i32
  }
}

</mosaic_0001>

<bundles_post_ra>
// kernel: tpu_custom_call.1
= control target key start
LH: loop header
LB: loop body
LE: loop exit
PB: predicated region body
PF: predicated region fallthrough
CT: control target
= control target key end

     0   :  { %9 = vsyncpa [#allocation4], 0  ;;  %s1927_s0 = inlined_call_operand.hbm [shape: bf16[256,256], index: 0, kind: input, shape index: {}]   ;;  %s1928_s1 = inlined_call_operand.hbm [shape: bf16[256,128], index: 1, kind: input, shape index: {}]   ;;  %s1929_s2 = inlined_call_operand.vmem [shape: f32[1,128], index: 2, kind: input, shape index: {}]   ;;  %s1930_s3 = inlined_call_operand.hbm [shape: bf16[128,128], index: 3, kind: input, shape index: {}]   ;;  %s1931_s4 = inlined_call_operand.hbm [shape: bf16[256,128], index: 4, kind: output, shape index: {}]  }
   0x1   :  { %10 = vsyncpa [#allocation7], 0 }
   0x2   :  { %11 = vsyncpa [#allocation5], 0  ;;  %s1788_s15 = smov [#allocation6]   ;;  %s1694_s19 = scalar_lea.hbm %s1928_s1, 2048 }
   0x3   :  { %s29_s16 = sshll.u32 %s1788_s15, 4  ;;  %p1695_p0 = scmp.ne.s32.totalorder %s1928_s1, %s1694_s19  ;;  %s30_s16 = int_to_ptr.vmem [resolvable:$true] %s29_s16 }
   0x4   :  { %p1698_p1 = scmp.lt.u32.totalorder %s1694_s19, %s1928_s1 }
   0x6   :  { %p1700_p2 = pnand %p1698_p1, %p1695_p0 }
   0x8   :  { %1703 = shalt.err (!%p1700_p2)
}
   0x9   :  { %s1704_s24 = scalar_lea.vmem %s30_s16, 2048  ;;  %p1709_p4 = scmp.lt.s32.totalorder %s30_s16, %s30_s16 }
   0xa   :  { %p1705_p3 = scmp.ne.s32.totalorder %s30_s16, %s1704_s24  ;;  %p1710_p5 = scmp.lt.s32.totalorder %s1704_s24, %s1704_s24 }
   0xc   :  { %p1711_p6 = por %p1710_p5, %p1709_p4 }
   0xe   :  { %p1712_p7 = pnand %p1711_p6, %p1705_p3 }
  0x10   :  { %1715 = shalt.err (!%p1712_p7)
}
  0x11   :  { %s1789_s25 = smov 64   ;;  %s1790_s26 = smov 4  }
  0x12   :  { %35 = dma.hbm_to_vmem [thread:$0]  %s1928_s1, 2048, %s30_s16, [#allocation7], %s1789_s25, %s1789_s25, %s1790_s26  }
  0x13   :  { %s1791_s29 = smov [#allocation3]   ;;  %s1716_s7 = scalar_lea.hbm %s1927_s0, 4096 }
  0x14   :  { %s17_s30 = sshll.u32 %s1791_s29, 4  ;;  %p1717_p8 = scmp.ne.s32.totalorder %s1927_s0, %s1716_s7  ;;  %s18_s30 = int_to_ptr.vmem [resolvable:$true] %s17_s30 }
  0x15   :  { %p1720_p9 = scmp.lt.u32.totalorder %s1716_s7, %s1927_s0 }
  0x17   :  { %p1722_p10 = pnand %p1720_p9, %p1717_p8 }
  0x19   :  { %1725 = shalt.err (!%p1722_p10)
}
  0x1a   :  { %s1726_s12 = scalar_lea.vmem %s18_s30, 4096  ;;  %p1731_p12 = scmp.lt.s32.totalorder %s18_s30, %s18_s30 }
  0x1b   :  { %p1727_p11 = scmp.ne.s32.totalorder %s18_s30, %s1726_s12  ;;  %p1732_p13 = scmp.lt.s32.totalorder %s1726_s12, %s1726_s12 }
  0x1d   :  { %p1733_p0 = por %p1732_p13, %p1731_p12 }
  0x1f   :  { %p1734_p1 = pnand %p1733_p0, %p1727_p11 }
  0x21   :  { %1737 = shalt.err (!%p1734_p1)
}
  0x22   :  { %s1792_s1 = smov 128   ;;  %s1793_s13 = smov 8  }
  0x23   :  { %23 = dma.hbm_to_vmem [thread:$0]  %s1927_s0, 4096, %s18_s30, [#allocation4], %s1792_s1, %s1792_s1, %s1793_s13  }
  0x24   :  { %s1794_s16 = smov [#allocation8]   ;;  %s1738_s20 = scalar_lea.hbm %s1930_s3, 1024 }
  0x25   :  { %s43_s17 = sshll.u32 %s1794_s16, 4  ;;  %p1739_p2 = scmp.ne.s32.totalorder %s1930_s3, %s1738_s20  ;;  %s44_s17 = int_to_ptr.vmem [resolvable:$true] %s43_s17 }
  0x26   :  { %p1742_p3 = scmp.lt.u32.totalorder %s1738_s20, %s1930_s3 }
  0x28   :  { %p1744_p4 = pnand %p1742_p3, %p1739_p2 }
  0x2a   :  { %1747 = shalt.err (!%p1744_p4)
}
  0x2b   :  { %s1748_s27 = scalar_lea.vmem %s44_s17, 1024  ;;  %p1753_p6 = scmp.lt.s32.totalorder %s44_s17, %s44_s17 }
  0x2c   :  { %p1749_p5 = scmp.ne.s32.totalorder %s44_s17, %s1748_s27  ;;  %p1754_p7 = scmp.lt.s32.totalorder %s1748_s27, %s1748_s27 }
  0x2e   :  { %p1755_p8 = por %p1754_p7, %p1753_p6 }
  0x30   :  { %p1756_p9 = pnand %p1755_p8, %p1749_p5 }
  0x32   :  { %1759 = shalt.err (!%p1756_p9)
}
  0x33   :  { %49 = dma.hbm_to_vmem [thread:$0]  %s1930_s3, 1024, %s44_s17, [#allocation7], %s1789_s25, %s1789_s25, %s1790_s26  }
  0x34   :  { %1782 = dma.done.wait [#allocation4], 4096  }
  0x35   :  { %1783 = vsyncadd [#allocation4], 4294963200 }
  0x36   :  { %1784 = dma.done.wait [#allocation7], 3072  }
  0x37   :  { %1785 = vsyncadd [#allocation7], 4294964224  ;;  %v1622_v0 = vld [vmem:[#allocation6 + $0x40] sm:$0xff]   ;;  %v1624_v2 = vld [vmem:[#allocation6 + $0x48] sm:$0xff]  }
  0x38   :  { %v1623_v1 = vld [vmem:[#allocation6] sm:$0xff]   ;;  %1414 = vmatprep.subr.bf16.mxu0 %v1622_v0  ;;  %1598 = vmatprep.subr.bf16.mxu1 %v1622_v0  ;;  %v1625_v3 = vld [vmem:[#allocation6 + $0x8] sm:$0xff]   ;;  %v1626_v4 = vld [vmem:[#allocation6 + $0x50] sm:$0xff]  }
  0x39   :  { %1415 = vmatpush3.bf16.msra.mxu0 %v1623_v1  ;;  %1606 = vmatpush3.bf16.msra.mxu1 %v1623_v1  ;;  %v1627_v5 = vld [vmem:[#allocation6 + $0x10] sm:$0xff]   ;;  %v1628_v6 = vld [vmem:[#allocation6 + $0x58] sm:$0xff]   ;;  %v1630_v8 = vld [vmem:[#allocation6 + $0x60] sm:$0xff]  }
  0x3a   :  { %1416 = vmatprep.subr.bf16.mxu0 %v1624_v2  ;;  %1599 = vmatprep.subr.bf16.mxu1 %v1624_v2  ;;  %v1629_v7 = vld [vmem:[#allocation6 + $0x18] sm:$0xff]   ;;  %v1631_v9 = vld [vmem:[#allocation6 + $0x20] sm:$0xff]   ;;  %v1632_v10 = vld [vmem:[#allocation6 + $0x68] sm:$0xff]  }
  0x3b   :  { %v1640_v11 = vld [vmem:[#allocation3 + $0x4] ss:$8 sps:$4 sm:$0xff]   ;;  %v1634_v13 = vld [vmem:[#allocation6 + $0x70] sm:$0xff]   ;;  %v1636_v15 = vld [vmem:[#allocation6 + $0x78] sm:$0xff]  }
  0x3c   :  { %v1633_v12 = vld [vmem:[#allocation6 + $0x28] sm:$0xff]   ;;  %480 = vmatprep.mubr.bf16.mxu0 %v1640_v11  ;;  %v1635_v14 = vld [vmem:[#allocation6 + $0x30] sm:$0xff]   ;;  %v1637_v16 = vld [vmem:[#allocation6 + $0x38] sm:$0xff]  }
  0x3d   :  { %1417 = vmatpush3.bf16.msra.mxu0 %v1625_v3  ;;  %1607 = vmatpush3.bf16.msra.mxu1 %v1625_v3  ;;  %v1638_v17 = vld [vmem:[#allocation3] ss:$8 sps:$4 sm:$0xff]   ;;  %v1670_v18 = vld [vmem:[#allocation3 + $0xc4] ss:$8 sps:$4 sm:$0xff]   ;;  %v1641_v19 = vld [vmem:[#allocation3 + $0x14] ss:$8 sps:$4 sm:$0xff]  }
  0x3e   :  { %1418 = vmatprep.subr.bf16.mxu0 %v1626_v4  ;;  %1600 = vmatprep.subr.bf16.mxu1 %v1626_v4  ;;  %v1668_v20 = vld [vmem:[#allocation3 + $0xc0] ss:$8 sps:$4 sm:$0xff]   ;;  %v1674_v21 = vld [vmem:[#allocation3 + $0xd4] ss:$8 sps:$4 sm:$0xff]   ;;  %v1643_v22 = vld [vmem:[#allocation3 + $0x10] ss:$8 sps:$4 sm:$0xff]  }
  0x3f   :  { %576 = vmatprep.mubr.bf16.mxu1 %v1670_v18  ;;  %v1644_v23 = vld [vmem:[#allocation3 + $0x24] ss:$8 sps:$4 sm:$0xff]   ;;  %v1676_v24 = vld [vmem:[#allocation3 + $0xd0] ss:$8 sps:$4 sm:$0xff]   ;;  %v1646_v29 = vld [vmem:[#allocation3 + $0x20] ss:$8 sps:$4 sm:$0xff]  }
  0x40   :  { %v1680_v25 = vld [vmem:[#allocation3 + $0xe4] ss:$8 sps:$4 sm:$0xff]   ;;  %v1688_v28 = vld [vmem:[#allocation8 + $0x10] sm:$0xff]   ;;  %v1682_v31 = vld [vmem:[#allocation3 + $0xe0] ss:$8 sps:$4 sm:$0xff]  }
  0x41   :  { %1419 = vmatpush3.bf16.msra.mxu0 %v1627_v5  ;;  %1608 = vmatpush3.bf16.msra.mxu1 %v1627_v5  ;;  %v1686_v26 = vld [vmem:[#allocation8] sm:$0xff]   ;;  %v1687_v27 = vld [vmem:[#allocation8 + $0x8] sm:$0xff]   ;;  %v1647_v30 = vld [vmem:[#allocation3 + $0x34] ss:$8 sps:$4 sm:$0xff]  }
  0x42   :  { %1420 = vmatprep.subr.bf16.mxu0 %v1628_v6  ;;  %1601 = vmatprep.subr.bf16.mxu1 %v1628_v6  ;;  %v1683_v32 = vld [vmem:[#allocation3 + $0xf4] ss:$8 sps:$4 sm:$0xff]   ;;  %v1649_v33 = vld [vmem:[#allocation3 + $0x30] ss:$8 sps:$4 sm:$0xff]   ;;  %v1650_v34 = vld [vmem:[#allocation3 + $0x44] ss:$8 sps:$4 sm:$0xff]  }
  0x43   :  { %v1685_v35 = vld [vmem:[#allocation3 + $0xf0] ss:$8 sps:$4 sm:$0xff]   ;;  %v1652_v36 = vld [vmem:[#allocation3 + $0x40] ss:$8 sps:$4 sm:$0xff]   ;;  %v1653_v37 = vld [vmem:[#allocation3 + $0x54] ss:$8 sps:$4 sm:$0xff]  }
  0x44   :  { %v1655_v38 = vld [vmem:[#allocation3 + $0x50] ss:$8 sps:$4 sm:$0xff]   ;;  %v1656_v39 = vld [vmem:[#allocation3 + $0x64] ss:$8 sps:$4 sm:$0xff]   ;;  %v1658_v40 = vld [vmem:[#allocation3 + $0x60] ss:$8 sps:$4 sm:$0xff]  }
  0x45   :  { %1421 = vmatpush3.bf16.msra.mxu0 %v1629_v7  ;;  %1609 = vmatpush3.bf16.msra.mxu1 %v1629_v7  ;;  %v1659_v41 = vld [vmem:[#allocation3 + $0x74] ss:$8 sps:$4 sm:$0xff]   ;;  %v1661_v42 = vld [vmem:[#allocation3 + $0x70] ss:$8 sps:$4 sm:$0xff]   ;;  %v1662_v43 = vld [vmem:[#allocation3 + $0x84] ss:$8 sps:$4 sm:$0xff]  }
  0x46   :  { %1422 = vmatprep.subr.bf16.mxu0 %v1630_v8  ;;  %1602 = vmatprep.subr.bf16.mxu1 %v1630_v8  ;;  %v1664_v44 = vld [vmem:[#allocation3 + $0x80] ss:$8 sps:$4 sm:$0xff]   ;;  %v1665_v45 = vld [vmem:[#allocation3 + $0x94] ss:$8 sps:$4 sm:$0xff]   ;;  %v1667_v46 = vld [vmem:[#allocation3 + $0x90] ss:$8 sps:$4 sm:$0xff]  }
  0x47   :  { %v1671_v47 = vld [vmem:[#allocation3 + $0xa4] ss:$8 sps:$4 sm:$0xff]   ;;  %v1673_v48 = vld [vmem:[#allocation3 + $0xa0] ss:$8 sps:$4 sm:$0xff]   ;;  %v1677_v49 = vld [vmem:[#allocation3 + $0xb4] ss:$8 sps:$4 sm:$0xff]  }
  0x48   :  { %v1689_v50 = vld [vmem:[#allocation8 + $0x18] sm:$0xff]   ;;  %v1690_v52 = vld [vmem:[#allocation8 + $0x20] sm:$0xff]   ;;  %v1691_v53 = vld [vmem:[#allocation8 + $0x28] sm:$0xff]  }
  0x49   :  { %1423 = vmatpush3.bf16.msra.mxu0 %v1631_v9  ;;  %1610 = vmatpush3.bf16.msra.mxu1 %v1631_v9  ;;  %v1679_v51 = vld [vmem:[#allocation3 + $0xb0] ss:$8 sps:$4 sm:$0xff]   ;;  %v1866_v58 = vld [vmem:[%s1929_s2] ss:$0 sm:$0xff]  ;;  %s1795_s2 = smov [#allocation9]  }
  0x4a   :  { %1424 = vmatprep.subr.bf16.mxu0 %v1632_v10  ;;  %1603 = vmatprep.subr.bf16.mxu1 %v1632_v10  ;;  %v1692_v54 = vld [vmem:[#allocation8 + $0x30] sm:$0xff]   ;;  %v1693_v55 = vld [vmem:[#allocation8 + $0x38] sm:$0xff]   ;;  %s1185_s30 = sshll.u32 %s1795_s2, 4  ;;  %s1186_s30 = int_to_ptr.vmem [resolvable:$true] %s1185_s30 }
  0x4b   :  { %s1760_s5 = scalar_lea.vmem %s1186_s30, 2048  ;;  %p1765_p11 = scmp.lt.s32.totalorder %s1186_s30, %s1186_s30 }
  0x4c   :  { %p1761_p10 = scmp.ne.s32.totalorder %s1186_s30, %s1760_s5  ;;  %p1766_p12 = scmp.lt.s32.totalorder %s1760_s5, %s1760_s5 }
  0x4d   :  { %1425 = vmatpush3.bf16.msra.mxu0 %v1633_v12  ;;  %1611 = vmatpush3.bf16.msra.mxu1 %v1633_v12 }
  0x4e   :  { %1426 = vmatprep.subr.bf16.mxu0 %v1634_v13  ;;  %1604 = vmatprep.subr.bf16.mxu1 %v1634_v13  ;;  %p1767_p13 = por %p1766_p12, %p1765_p11 }
  0x50   :  { %p1768_p0 = pnand %p1767_p13, %p1761_p10 }
  0x51   :  { %1427 = vmatpush3.bf16.msra.mxu0 %v1635_v14  ;;  %1612 = vmatpush3.bf16.msra.mxu1 %v1635_v14 }
  0x52   :  { %1428 = vmatprep.subr.bf16.mxu0 %v1636_v15  ;;  %1605 = vmatprep.subr.bf16.mxu1 %v1636_v15 }
  0x55   :  { %1429 = vmatpush3.bf16.msra.mxu0 %v1637_v16  ;;  %1613 = vmatpush3.bf16.msra.mxu1 %v1637_v16 }
  0x56   :  { %1550 = vmatprep.subr.bf16.mxu1 %v1686_v26 }
  0x58   :  { %481 = vmatmul.mubr.bf16.vlgmr.msra.gmra.mrb[0].mxu0 %v1638_v17  ;;  %577 = vmatmul.mubr.bf16.vlgmr.msra.gmra.mrb[0].mxu1 %v1668_v20 }
  0x59   :  { %488 = vmatprep.mubr.bf16.mxu0 %v1641_v19  ;;  %584 = vmatprep.mubr.bf16.mxu1 %v1674_v21 }
  0x5a   :  { %1551 = vmatpush3.bf16.msra.mxu1 %v1686_v26 }
  0x5b   :  { %1552 = vmatprep.subr.bf16.mxu1 %v1687_v27 }
  0x5e   :  { %1553 = vmatpush3.bf16.msra.mxu1 %v1687_v27 }
  0x5f   :  { %1554 = vmatprep.subr.bf16.mxu1 %v1688_v28 }
  0x60   :  { %489 = vmatmul.mubr.bf16.gmra.mrb[4].mxu0 %v1643_v22  ;;  %585 = vmatmul.mubr.bf16.gmra.mrb[4].mxu1 %v1676_v24 }
  0x61   :  { %496 = vmatprep.mubr.bf16.mxu0 %v1644_v23  ;;  %592 = vmatprep.mubr.bf16.mxu1 %v1680_v25 }
  0x62   :  { %1555 = vmatpush3.bf16.msra.mxu1 %v1688_v28 }
  0x63   :  { %1556 = vmatprep.subr.bf16.mxu1 %v1689_v50 }
  0x66   :  { %1557 = vmatpush3.bf16.msra.mxu1 %v1689_v50 }
  0x67   :  { %1558 = vmatprep.subr.bf16.mxu1 %v1690_v52 }
  0x68   :  { %497 = vmatmul.mubr.bf16.gmra.mrb[8].mxu0 %v1646_v29  ;;  %593 = vmatmul.mubr.bf16.gmra.mrb[8].mxu1 %v1682_v31 }
  0x69   :  { %504 = vmatprep.mubr.bf16.mxu0 %v1647_v30  ;;  %600 = vmatprep.mubr.bf16.mxu1 %v1683_v32 }
  0x6a   :  { %1559 = vmatpush3.bf16.msra.mxu1 %v1690_v52 }
  0x6b   :  { %1560 = vmatprep.subr.bf16.mxu1 %v1691_v53 }
  0x6e   :  { %1561 = vmatpush3.bf16.msra.mxu1 %v1691_v53 }
  0x6f   :  { %1562 = vmatprep.subr.bf16.mxu1 %v1692_v54 }
  0x70   :  { %505 = vmatmul.mubr.bf16.gmra.mrb[12].mxu0 %v1649_v33  ;;  %601 = vmatmul.mubr.bf16.gmra.mrb[12].mxu1 %v1685_v35 }
  0x71   :  { %512 = vmatprep.mubr.bf16.mxu0 %v1650_v34 }
  0x72   :  { %1563 = vmatpush3.bf16.msra.mxu1 %v1692_v54 }
  0x73   :  { %1564 = vmatprep.subr.bf16.mxu1 %v1693_v55 }
  0x76   :  { %1565 = vmatpush3.bf16.msra.mxu1 %v1693_v55 }
  0x78   :  { %513 = vmatmul.mubr.bf16.gmra.mrb[16].mxu0 %v1652_v36 }
  0x79   :  { %520 = vmatprep.mubr.bf16.mxu0 %v1653_v37 }
  0x80   :  { %521 = vmatmul.mubr.bf16.gmra.mrb[20].mxu0 %v1655_v38 }
  0x81   :  { %528 = vmatprep.mubr.bf16.mxu0 %v1656_v39 }
  0x88   :  { %529 = vmatmul.mubr.bf16.gmra.mrb[24].mxu0 %v1658_v40 }
  0x89   :  { %536 = vmatprep.mubr.bf16.mxu0 %v1659_v41 }
  0x90   :  { %537 = vmatmul.mubr.bf16.gmra.mrb[28].mxu0 %v1661_v42 }
  0x91   :  { %544 = vmatprep.mubr.bf16.mxu0 %v1662_v43 }
  0x98   :  { %545 = vmatmul.mubr.bf16.gmra.mrb[32].mxu0 %v1664_v44 }
  0x99   :  { %552 = vmatprep.mubr.bf16.mxu0 %v1665_v45 }
  0xa0   :  { %553 = vmatmul.mubr.bf16.gmra.mrb[36].mxu0 %v1667_v46 }
  0xa1   :  { %560 = vmatprep.mubr.bf16.mxu0 %v1671_v47 }
  0xa8   :  { %561 = vmatmul.mubr.bf16.gmra.mrb[40].mxu0 %v1673_v48 }
  0xa9   :  { %568 = vmatprep.mubr.bf16.mxu0 %v1677_v49 }
  0xb0   :  { %569 = vmatmul.mubr.bf16.gmra.mrb[44].mxu0 %v1679_v51 }
 0x12b   :  { %v1430_v56 = vpop.f32.mrb[0].mxu0  ;;  %v1502_v59 = vpop.f32.mrb[0].mxu1 }
 0x12c   :  { %v1431_v57 = vpop.f32.mrb[1].mxu0  ;;  %v1503_v62 = vpop.f32.mrb[1].mxu1 }
 0x12d   :  { %v1432_v60 = vadd.f32 %v1431_v57, %v1430_v56  ;;  %v1433_v61 = vpop.f32.mrb[2].mxu0  ;;  %v1504_v0 = vadd.f32 %v1503_v62, %v1502_v59  ;;  %v1505_v1 = vpop.f32.mrb[2].mxu1 }
 0x12e   :  { %v1434_v63 = vpop.f32.mrb[3].mxu0  ;;  %v1506_v4 = vpop.f32.mrb[3].mxu1 }
 0x12f   :  { %v715_v2 = vadd.f32 %v1432_v60, %v1866_v58  ;;  %v1435_v3 = vadd.f32 %v1434_v63, %v1433_v61  ;;  %v739_v5 = vadd.f32 %v1504_v0, %v1866_v58  ;;  %v1507_v6 = vadd.f32 %v1506_v4, %v1505_v1 }
 0x131   :  { %v716_v7 = vadd.f32 %v1435_v3, %v1866_v58  ;;  %v771_v8 = vmax.f32 %v739_v5, 0.0  ;;  %v740_v9 = vadd.f32 %v1507_v6, %v1866_v58  ;;  %v747_v10 = vmax.f32 %v715_v2, 0.0 }
 0x133   :  { %v748_v11 = vmax.f32 %v716_v7, 0.0  ;;  %v1436_v12 = vpop.f32.mrb[4].mxu0  ;;  %v772_v14 = vmax.f32 %v740_v9, 0.0  ;;  %v1508_v15 = vpop.f32.mrb[4].mxu1 }
 0x134   :  { %v1437_v13 = vpop.f32.mrb[5].mxu0  ;;  %v1509_v19 = vpop.f32.mrb[5].mxu1 }
 0x135   :  { %v1438_v16 = vadd.f32 %v1437_v13, %v1436_v12  ;;  %v1439_v17 = vpop.f32.mrb[6].mxu0  ;;  %v779_v18 = vpack.c.bf16 %v748_v11, %v747_v10  ;;  %v1510_v21 = vadd.f32 %v1509_v19, %v1508_v15  ;;  %v1511_v22 = vpop.f32.mrb[6].mxu1  ;;  %v1872_v23 = vpack.c.bf16 %v772_v14, %v771_v8 }
 0x136   :  { %v1440_v20 = vpop.f32.mrb[7].mxu0  ;;  %v1512_v26 = vpop.f32.mrb[7].mxu1 }
 0x137   :  { %v717_v24 = vadd.f32 %v1438_v16, %v1866_v58  ;;  %v1441_v25 = vadd.f32 %v1440_v20, %v1439_v17  ;;  %1566 = vmatprep.mubr.bf16.mxu1 %v779_v18  ;;  %v741_v27 = vadd.f32 %v1510_v21, %v1866_v58  ;;  %v1513_v28 = vadd.f32 %v1512_v26, %v1511_v22 }
 0x139   :  { %v718_v29 = vadd.f32 %v1441_v25, %v1866_v58  ;;  %v773_v30 = vmax.f32 %v741_v27, 0.0  ;;  %v742_v31 = vadd.f32 %v1513_v28, %v1866_v58  ;;  %v749_v32 = vmax.f32 %v717_v24, 0.0 }
 0x13b   :  { %v750_v33 = vmax.f32 %v718_v29, 0.0  ;;  %v1442_v34 = vpop.f32.mrb[8].mxu0  ;;  %v774_v36 = vmax.f32 %v742_v31, 0.0  ;;  %v1514_v37 = vpop.f32.mrb[8].mxu1 }
 0x13c   :  { %v1443_v35 = vpop.f32.mrb[9].mxu0  ;;  %v1515_v41 = vpop.f32.mrb[9].mxu1 }
 0x13d   :  { %v780_v38 = vpack.c.bf16 %v750_v33, %v749_v32  ;;  %v1444_v39 = vadd.f32 %v1443_v35, %v1442_v34  ;;  %v1445_v40 = vpop.f32.mrb[10].mxu0  ;;  %v1516_v43 = vadd.f32 %v1515_v41, %v1514_v37  ;;  %v1517_v44 = vpop.f32.mrb[10].mxu1  ;;  %v1878_v45 = vpack.c.bf16 %v774_v36, %v773_v30 }
 0x13e   :  { %v1446_v42 = vpop.f32.mrb[11].mxu0  ;;  %v1518_v48 = vpop.f32.mrb[11].mxu1 }
 0x13f   :  { %v719_v46 = vadd.f32 %v1444_v39, %v1866_v58  ;;  %v1447_v47 = vadd.f32 %v1446_v42, %v1445_v40  ;;  %1567 = vmatmul.mubr.bf16.vlgmr.msra.gmra.mrb[16].mxu1 %v780_v38  ;;  %v743_v49 = vadd.f32 %v1516_v43, %v1866_v58  ;;  %v1519_v50 = vadd.f32 %v1518_v48, %v1517_v44 }
 0x141   :  { %v720_v51 = vadd.f32 %v1447_v47, %v1866_v58  ;;  %v775_v52 = vmax.f32 %v743_v49, 0.0  ;;  %v744_v53 = vadd.f32 %v1519_v50, %v1866_v58  ;;  %v751_v54 = vmax.f32 %v719_v46, 0.0 }
 0x143   :  { %v752_v55 = vmax.f32 %v720_v51, 0.0  ;;  %v1448_v56 = vpop.f32.mrb[12].mxu0  ;;  %v776_v59 = vmax.f32 %v744_v53, 0.0  ;;  %v1520_v60 = vpop.f32.mrb[12].mxu1 }
 0x144   :  { %v1449_v57 = vpop.f32.mrb[13].mxu0  ;;  %v1521_v0 = vpop.f32.mrb[13].mxu1 }
 0x145   :  { %v1450_v61 = vadd.f32 %v1449_v57, %v1448_v56  ;;  %v1451_v62 = vpop.f32.mrb[14].mxu0  ;;  %v781_v63 = vpack.c.bf16 %v752_v55, %v751_v54  ;;  %v1522_v2 = vadd.f32 %v1521_v0, %v1520_v60  ;;  %v1523_v3 = vpop.f32.mrb[14].mxu1  ;;  %v1884_v4 = vpack.c.bf16 %v776_v59, %v775_v52 }
 0x146   :  { %v1452_v1 = vpop.f32.mrb[15].mxu0  ;;  %v1524_v7 = vpop.f32.mrb[15].mxu1 }
 0x147   :  { %v721_v5 = vadd.f32 %v1450_v61, %v1866_v58  ;;  %v1453_v6 = vadd.f32 %v1452_v1, %v1451_v62  ;;  %1570 = vmatprep.mubr.bf16.mxu1 %v781_v63  ;;  %v745_v8 = vadd.f32 %v1522_v2, %v1866_v58  ;;  %v1525_v9 = vadd.f32 %v1524_v7, %v1523_v3 }
 0x149   :  { %v722_v10 = vadd.f32 %v1453_v6, %v1866_v58  ;;  %v777_v11 = vmax.f32 %v745_v8, 0.0  ;;  %v746_v12 = vadd.f32 %v1525_v9, %v1866_v58  ;;  %v753_v13 = vmax.f32 %v721_v5, 0.0 }
 0x14b   :  { %v754_v14 = vmax.f32 %v722_v10, 0.0  ;;  %v1454_v15 = vpop.f32.mrb[16].mxu0  ;;  %v778_v17 = vmax.f32 %v746_v12, 0.0 }
 0x14c   :  { %v1455_v16 = vpop.f32.mrb[17].mxu0 }
 0x14d   :  { %v1456_v18 = vadd.f32 %v1455_v16, %v1454_v15  ;;  %v1457_v19 = vpop.f32.mrb[18].mxu0  ;;  %v782_v20 = vpack.c.bf16 %v754_v14, %v753_v13  ;;  %v1890_v22 = vpack.c.bf16 %v778_v17, %v777_v11 }
 0x14e   :  { %v1458_v21 = vpop.f32.mrb[19].mxu0 }
 0x14f   :  { %v723_v24 = vadd.f32 %v1456_v18, %v1866_v58  ;;  %v1459_v25 = vadd.f32 %v1458_v21, %v1457_v19  ;;  %1571 = vmatmul.mubr.bf16.gmra.mrb[20].mxu1 %v782_v20 }
 0x151   :  { %v724_v26 = vadd.f32 %v1459_v25, %v1866_v58  ;;  %v755_v27 = vmax.f32 %v723_v24, 0.0 }
 0x153   :  { %v756_v28 = vmax.f32 %v724_v26, 0.0  ;;  %v1460_v29 = vpop.f32.mrb[20].mxu0 }
 0x154   :  { %v1461_v30 = vpop.f32.mrb[21].mxu0 }
 0x155   :  { %v1462_v31 = vadd.f32 %v1461_v30, %v1460_v29  ;;  %v1463_v32 = vpop.f32.mrb[22].mxu0  ;;  %v783_v33 = vpack.c.bf16 %v756_v28, %v755_v27 }
 0x156   :  { %v1464_v34 = vpop.f32.mrb[23].mxu0 }
 0x157   :  { %v725_v35 = vadd.f32 %v1462_v31, %v1866_v58  ;;  %v1465_v36 = vadd.f32 %v1464_v34, %v1463_v32  ;;  %1574 = vmatprep.mubr.bf16.mxu1 %v783_v33 }
 0x159   :  { %v726_v37 = vadd.f32 %v1465_v36, %v1866_v58  ;;  %v757_v38 = vmax.f32 %v725_v35, 0.0 }
 0x15b   :  { %v758_v39 = vmax.f32 %v726_v37, 0.0  ;;  %v1466_v40 = vpop.f32.mrb[24].mxu0 }
 0x15c   :  { %v1467_v41 = vpop.f32.mrb[25].mxu0 }
 0x15d   :  { %v1468_v42 = vadd.f32 %v1467_v41, %v1466_v40  ;;  %v1469_v43 = vpop.f32.mrb[26].mxu0  ;;  %v784_v44 = vpack.c.bf16 %v758_v39, %v757_v38 }
 0x15e   :  { %v1470_v46 = vpop.f32.mrb[27].mxu0 }
 0x15f   :  { %v727_v47 = vadd.f32 %v1468_v42, %v1866_v58  ;;  %v1471_v48 = vadd.f32 %v1470_v46, %v1469_v43  ;;  %1575 = vmatmul.mubr.bf16.gmra.mrb[24].mxu1 %v784_v44 }
 0x161   :  { %v728_v49 = vadd.f32 %v1471_v48, %v1866_v58  ;;  %v759_v50 = vmax.f32 %v727_v47, 0.0 }
 0x163   :  { %v760_v51 = vmax.f32 %v728_v49, 0.0  ;;  %v1472_v52 = vpop.f32.mrb[28].mxu0 }
 0x164   :  { %v1473_v53 = vpop.f32.mrb[29].mxu0 }
 0x165   :  { %v1474_v54 = vadd.f32 %v1473_v53, %v1472_v52  ;;  %v1475_v55 = vpop.f32.mrb[30].mxu0  ;;  %v785_v56 = vpack.c.bf16 %v760_v51, %v759_v50 }
 0x166   :  { %v1476_v57 = vpop.f32.mrb[31].mxu0 }
 0x167   :  { %v729_v59 = vadd.f32 %v1474_v54, %v1866_v58  ;;  %v1477_v60 = vadd.f32 %v1476_v57, %v1475_v55  ;;  %1578 = vmatprep.mubr.bf16.mxu1 %v785_v56 }
 0x169   :  { %v730_v61 = vadd.f32 %v1477_v60, %v1866_v58  ;;  %v761_v62 = vmax.f32 %v729_v59, 0.0 }
 0x16b   :  { %v762_v63 = vmax.f32 %v730_v61, 0.0  ;;  %v1478_v0 = vpop.f32.mrb[32].mxu0 }
 0x16c   :  { %v1479_v1 = vpop.f32.mrb[33].mxu0 }
 0x16d   :  { %v1480_v2 = vadd.f32 %v1479_v1, %v1478_v0  ;;  %v1481_v3 = vpop.f32.mrb[34].mxu0  ;;  %v786_v5 = vpack.c.bf16 %v762_v63, %v761_v62 }
 0x16e   :  { %v1482_v6 = vpop.f32.mrb[35].mxu0 }
 0x16f   :  { %v731_v7 = vadd.f32 %v1480_v2, %v1866_v58  ;;  %v1483_v8 = vadd.f32 %v1482_v6, %v1481_v3  ;;  %1579 = vmatmul.mubr.bf16.gmra.mrb[28].mxu1 %v786_v5 }
 0x171   :  { %v732_v9 = vadd.f32 %v1483_v8, %v1866_v58  ;;  %v763_v10 = vmax.f32 %v731_v7, 0.0 }
 0x173   :  { %v764_v11 = vmax.f32 %v732_v9, 0.0  ;;  %v1484_v12 = vpop.f32.mrb[36].mxu0 }
 0x174   :  { %v1485_v13 = vpop.f32.mrb[37].mxu0 }
 0x175   :  { %v1486_v14 = vadd.f32 %v1485_v13, %v1484_v12  ;;  %v1487_v15 = vpop.f32.mrb[38].mxu0  ;;  %v787_v16 = vpack.c.bf16 %v764_v11, %v763_v10 }
 0x176   :  { %v1488_v17 = vpop.f32.mrb[39].mxu0 }
 0x177   :  { %v733_v18 = vadd.f32 %v1486_v14, %v1866_v58  ;;  %v1489_v19 = vadd.f32 %v1488_v17, %v1487_v15  ;;  %1582 = vmatprep.mubr.bf16.mxu1 %v787_v16 }
 0x179   :  { %v734_v20 = vadd.f32 %v1489_v19, %v1866_v58  ;;  %v765_v21 = vmax.f32 %v733_v18, 0.0 }
 0x17b   :  { %v766_v24 = vmax.f32 %v734_v20, 0.0  ;;  %v1490_v25 = vpop.f32.mrb[40].mxu0 }
 0x17c   :  { %v1491_v26 = vpop.f32.mrb[41].mxu0 }
 0x17d   :  { %v1492_v27 = vadd.f32 %v1491_v26, %v1490_v25  ;;  %v1493_v28 = vpop.f32.mrb[42].mxu0  ;;  %v788_v29 = vpack.c.bf16 %v766_v24, %v765_v21 }
 0x17e   :  { %v1494_v30 = vpop.f32.mrb[43].mxu0 }
 0x17f   :  { %v735_v31 = vadd.f32 %v1492_v27, %v1866_v58  ;;  %v1495_v32 = vadd.f32 %v1494_v30, %v1493_v28  ;;  %1583 = vmatmul.mubr.bf16.gmra.mrb[32].mxu1 %v788_v29 }
 0x181   :  { %v736_v33 = vadd.f32 %v1495_v32, %v1866_v58  ;;  %v767_v34 = vmax.f32 %v735_v31, 0.0 }
 0x183   :  { %v768_v35 = vmax.f32 %v736_v33, 0.0  ;;  %v1496_v36 = vpop.f32.mrb[44].mxu0 }
 0x184   :  { %v1497_v37 = vpop.f32.mrb[45].mxu0 }
 0x185   :  { %v1498_v38 = vadd.f32 %v1497_v37, %v1496_v36  ;;  %v1499_v39 = vpop.f32.mrb[46].mxu0  ;;  %v789_v40 = vpack.c.bf16 %v768_v35, %v767_v34 }
 0x186   :  { %v1500_v41 = vpop.f32.mrb[47].mxu0 }
 0x187   :  { %v737_v42 = vadd.f32 %v1498_v38, %v1866_v58  ;;  %v1501_v43 = vadd.f32 %v1500_v41, %v1499_v39  ;;  %1586 = vmatprep.mubr.bf16.mxu1 %v789_v40 }
 0x189   :  { %v738_v44 = vadd.f32 %v1501_v43, %v1866_v58  ;;  %v769_v46 = vmax.f32 %v737_v42, 0.0 }
 0x18b   :  { %v770_v47 = vmax.f32 %v738_v44, 0.0 }
 0x18d   :  { %v790_v48 = vpack.c.bf16 %v770_v47, %v769_v46 }
 0x18f   :  { %1587 = vmatmul.mubr.bf16.gmra.mrb[36].mxu1 %v790_v48 }
 0x190   :  { %1590 = vmatprep.mubr.bf16.mxu1 %v1872_v23 }
 0x197   :  { %1591 = vmatmul.mubr.bf16.gmra.mrb[40].mxu1 %v1878_v45 }
 0x198   :  { %1594 = vmatprep.mubr.bf16.mxu1 %v1884_v4 }
 0x19f   :  { %1595 = vmatmul.mubr.bf16.gmra.mrb[44].mxu1 %v1890_v22 }
 0x212   :  { %v1568_v49 = vpop.f32.mrb[16].mxu1 }
 0x213   :  { %v893_v50 = vpop.f32.mrb[17].mxu1 }
 0x214   :  { %v1569_v51 = vpop.f32.mrb[18].mxu1 }
 0x215   :  { %v1327_v52 = vpack.c.bf16 %v1569_v51, %v1568_v49  ;;  %v896_v53 = vpop.f32.mrb[19].mxu1 }
 0x216   :  { %v1322_v54 = vpack.c.bf16 %v896_v53, %v893_v50 }
 0x217   :  { %1399 = vst [vmem:[#allocation9 + $0x8] sm:$0xff] %v1327_v52  }
 0x218   :  { %1323 = vst [vmem:[#allocation9] sm:$0xff] %v1322_v54  }
 0x222   :  { %v1572_v58 = vpop.f32.mrb[20].mxu1 }
 0x223   :  { %v909_v55 = vpop.f32.mrb[21].mxu1 }
 0x224   :  { %v1573_v56 = vpop.f32.mrb[22].mxu1 }
 0x225   :  { %v1337_v57 = vpack.c.bf16 %v1573_v56, %v1572_v58  ;;  %v912_v59 = vpop.f32.mrb[23].mxu1 }
 0x226   :  { %v1332_v23 = vpack.c.bf16 %v912_v59, %v909_v55 }
 0x227   :  { %1401 = vst [vmem:[#allocation9 + $0x18] sm:$0xff] %v1337_v57  }
 0x228   :  { %1400 = vst [vmem:[#allocation9 + $0x10] sm:$0xff] %v1332_v23  }
 0x232   :  { %v1576_v45 = vpop.f32.mrb[24].mxu1 }
 0x233   :  { %v925_v4 = vpop.f32.mrb[25].mxu1 }
 0x234   :  { %v1577_v60 = vpop.f32.mrb[26].mxu1 }
 0x235   :  { %v1347_v22 = vpack.c.bf16 %v1577_v60, %v1576_v45  ;;  %v928_v61 = vpop.f32.mrb[27].mxu1 }
 0x236   :  { %v1342_v62 = vpack.c.bf16 %v928_v61, %v925_v4 }
 0x237   :  { %1403 = vst [vmem:[#allocation9 + $0x28] sm:$0xff] %v1347_v22  }
 0x238   :  { %1402 = vst [vmem:[#allocation9 + $0x20] sm:$0xff] %v1342_v62  }
 0x242   :  { %v1580_v63 = vpop.f32.mrb[28].mxu1 }
 0x243   :  { %v941_v0 = vpop.f32.mrb[29].mxu1 }
 0x244   :  { %v1581_v1 = vpop.f32.mrb[30].mxu1 }
 0x245   :  { %v1357_v2 = vpack.c.bf16 %v1581_v1, %v1580_v63  ;;  %v944_v3 = vpop.f32.mrb[31].mxu1 }
 0x246   :  { %v1352_v5 = vpack.c.bf16 %v944_v3, %v941_v0 }
 0x247   :  { %1405 = vst [vmem:[#allocation9 + $0x38] sm:$0xff] %v1357_v2  }
 0x248   :  { %1404 = vst [vmem:[#allocation9 + $0x30] sm:$0xff] %v1352_v5  }
 0x252   :  { %v1584_v6 = vpop.f32.mrb[32].mxu1 }
 0x253   :  { %v957_v7 = vpop.f32.mrb[33].mxu1 }
 0x254   :  { %v1585_v8 = vpop.f32.mrb[34].mxu1 }
 0x255   :  { %v1367_v9 = vpack.c.bf16 %v1585_v8, %v1584_v6  ;;  %v960_v10 = vpop.f32.mrb[35].mxu1 }
 0x256   :  { %v1362_v11 = vpack.c.bf16 %v960_v10, %v957_v7 }
 0x257   :  { %1407 = vst [vmem:[#allocation9 + $0x48] sm:$0xff] %v1367_v9  }
 0x258   :  { %1406 = vst [vmem:[#allocation9 + $0x40] sm:$0xff] %v1362_v11  }
 0x262   :  { %v1588_v12 = vpop.f32.mrb[36].mxu1 }
 0x263   :  { %v973_v13 = vpop.f32.mrb[37].mxu1 }
 0x264   :  { %v1589_v14 = vpop.f32.mrb[38].mxu1 }
 0x265   :  { %v1377_v15 = vpack.c.bf16 %v1589_v14, %v1588_v12  ;;  %v976_v16 = vpop.f32.mrb[39].mxu1 }
 0x266   :  { %v1372_v17 = vpack.c.bf16 %v976_v16, %v973_v13 }
 0x267   :  { %1409 = vst [vmem:[#allocation9 + $0x58] sm:$0xff] %v1377_v15  }
 0x268   :  { %1408 = vst [vmem:[#allocation9 + $0x50] sm:$0xff] %v1372_v17  }
 0x26a   :  { %v1592_v18 = vpop.f32.mrb[40].mxu1 }
 0x26b   :  { %v989_v19 = vpop.f32.mrb[41].mxu1 }
 0x26c   :  { %v1593_v20 = vpop.f32.mrb[42].mxu1 }
 0x26d   :  { %v1387_v21 = vpack.c.bf16 %v1593_v20, %v1592_v18  ;;  %v992_v24 = vpop.f32.mrb[43].mxu1 }
 0x26e   :  { %v1382_v25 = vpack.c.bf16 %v992_v24, %v989_v19 }
 0x26f   :  { %1411 = vst [vmem:[#allocation9 + $0x68] sm:$0xff] %v1387_v21  }
 0x270   :  { %1410 = vst [vmem:[#allocation9 + $0x60] sm:$0xff] %v1382_v25  }
 0x272   :  { %v1596_v26 = vpop.f32.mrb[44].mxu1 }
 0x273   :  { %v1005_v27 = vpop.f32.mrb[45].mxu1 }
 0x274   :  { %v1597_v28 = vpop.f32.mrb[46].mxu1 }
 0x275   :  { %v1397_v29 = vpack.c.bf16 %v1597_v28, %v1596_v26  ;;  %v1008_v30 = vpop.f32.mrb[47].mxu1 }
 0x276   :  { %v1392_v31 = vpack.c.bf16 %v1008_v30, %v1005_v27 }
 0x277   :  { %1413 = vst [vmem:[#allocation9 + $0x78] sm:$0xff] %v1397_v29  }
 0x278   :  { %1412 = vst [vmem:[#allocation9 + $0x70] sm:$0xff] %v1392_v31  }
 0x279   :  { %1771 = shalt.err (!%p1768_p0)
}
 0x27a   :  { %s1772_s8 = scalar_lea.hbm %s1931_s4, 2048 }
 0x27b   :  { %p1773_p1 = scmp.ne.s32.totalorder %s1931_s4, %s1772_s8  ;;  %p1776_p2 = scmp.lt.u32.totalorder %s1772_s8, %s1931_s4 }
 0x27d   :  { %p1778_p3 = pnand %p1776_p2, %p1773_p1 }
 0x27f   :  { %1781 = shalt.err (!%p1778_p3)
}
 0x280   :  { %1191 = dma.vmem_to_hbm [thread:$0]  %s1186_s30, 2048, %s1931_s4, [#allocation5], %s1789_s25, %s1789_s25, %s1790_s26  }
 0x281   :  { %1786 = dma.done.wait [#allocation5], 2048  }
 0x282   :  { %1787 = vsyncadd [#allocation5], 4294965248 }
 0x283   :  { %1195 = vsyncpa [#allocation4], 1 }
 0x284   :  { %1196 = vsyncpa [#allocation7], 1 }
 0x285   :  { %1197 = vsyncpa [#allocation5], 1 }

</bundles_post_ra>
